<compile_context>
chip_gen: v7x
topology: tpu7x:2x2x1
jax: 0.10.0
libtpu: 0.0.40
codegen_flags: <defaults>
</compile_context>

<pallas_src>
import functools
import math

import jax
import jax.numpy as jnp
from jax.experimental import pallas as pl
from jax.experimental.pallas import tpu as pltpu

_LANES = 128
_SUBLANES = 8
_MAX_BLOCK_ROWS = 8192          # (8192,128) f32 = 4 MiB per input per buffer.
_VMEM_LIMIT_BYTES = 24 << 20    # 2 inputs x 2 buffers x 4 MiB = 16 MiB + slack.

# f32 sigmoid saturation points.  Beyond these, torch's naive formula
#   L = p*y*(-log(sigmoid(x))) + (1-y)*(-log(1-sigmoid(x)))
# produces 0 * inf = NaN for a hard label on its "correct" side, and
# torch.nansum / torch.nanmean silently drop that element (sum AND mean
# denominator).  We reproduce the drop with two cheap VPU compares instead of
# materialising the NaN.
_SIGMOID_SAT_HI = 16.635532     # sigmoid(x) rounds to 1.0f above this
_SIGMOID_SAT_LO = -88.722839    # sigmoid(x) underflows to 0.0f below this


def _longitudinal_loss_kernel(logits_ref, labels_ref, out_ref,
                              acc_sum_ref, acc_cnt_ref,
                              *, pos_weight, valid_rows, block_rows):
    j = pl.program_id(1)
    nj = pl.num_programs(1)

    # Zero the vector accumulators at the start of this core's row range.
    @pl.when(j == 0)
    def _():
        acc_sum_ref[...] = jnp.zeros_like(acc_sum_ref)
        acc_cnt_ref[...] = jnp.zeros_like(acc_cnt_ref)

    # Unclamped global block index: rows of partial / phantom tail blocks are
    # masked out below (the DMA index_map clamps, so the data read is valid).
    gb = pl.program_id(0) * nj + j
    row0 = gb * block_rows

    logits = logits_ref[...].astype(jnp.float32)
    labels = labels_ref[...].astype(jnp.float32)
    p = jnp.float32(pos_weight)

    def accumulate(row_mask):
        # idx = ~isnan(labels): mask instead of boolean gather (static shapes).
        valid = labels == labels                      # NaN != NaN
        lab = jnp.where(valid, labels, jnp.float32(0.0))

        # Shared-softplus BCE: 1 exp + 1 log per element on the EUP.
        #   sp_neg = -log(sigmoid(x)) ; sp_pos = -log(1-sigmoid(x)) = sp_neg + x
        # (log(1+e) instead of log1p: accuracy only differs deep in the
        #  saturated tail where the element's contribution is < 1e-7 anyway.)
        e = jnp.exp(-jnp.abs(logits))
        sp_neg = jnp.maximum(-logits, jnp.float32(0.0)) + jnp.log(jnp.float32(1.0) + e)
        sp_pos = sp_neg + logits
        L = p * lab * sp_neg + (jnp.float32(1.0) - lab) * sp_pos

        # torch drops elements whose naive formula gives 0 * inf = NaN:
        # hard label on the saturated side of an f32 sigmoid.
        # TODO(synk): wrong-side extreme saturation (|x| beyond the f32 sigmoid
        # saturation point with the opposite hard label) yields a large finite
        # value here instead of torch's inf.
        drop = jnp.logical_or(
            jnp.logical_and(lab == jnp.float32(1.0),
                            logits >= jnp.float32(_SIGMOID_SAT_HI)),
            jnp.logical_and(lab == jnp.float32(0.0),
                            logits <= jnp.float32(_SIGMOID_SAT_LO)))
        keep = jnp.logical_and(valid, jnp.logical_not(drop))
        if row_mask is not None:
            keep = jnp.logical_and(keep, row_mask)

        # Select form (not multiply): OOB rows of a partial tail block hold
        # stale VMEM, and garbage * 0 could still leak NaN/inf.
        Lm = jnp.where(keep, L, jnp.float32(0.0))
        cnt = keep.astype(jnp.float32)

        # (8,128) vector accumulators: per-step reduction is pure VALU adds;
        # the cross-sublane/lane collapse happens once, on the last step.
        # (f32 count stays integer-exact up to 2^24 per cell, i.e. >17B
        #  elements per core — plenty.)
        acc_sum_ref[...] += Lm.reshape(block_rows // _SUBLANES,
                                       _SUBLANES, _LANES).sum(axis=0)
        acc_cnt_ref[...] += cnt.reshape(block_rows // _SUBLANES,
                                        _SUBLANES, _LANES).sum(axis=0)

    full_block = (row0 + block_rows) <= valid_rows

    @pl.when(full_block)
    def _():
        accumulate(None)                               # fast path: no row mask

    @pl.when(jnp.logical_not(full_block))
    def _():
        # Tail / phantom block: mask rows beyond the real input.
        row_ids = jax.lax.broadcasted_iota(jnp.int32, (block_rows, _LANES), 0)
        accumulate((row0 + row_ids) < valid_rows)

    @pl.when(j == nj - 1)
    def _():
        out_ref[0, 0] = jnp.sum(acc_sum_ref[...])
        out_ref[0, 1] = jnp.sum(acc_cnt_ref[...])


def _round_up(x, m):
    return ((x + m - 1) // m) * m


def _tensorcore_count():
    """TensorCores sharing this chip's HBM (v7x: 2; v5e/v6e: 1)."""
    # TODO(synk): v4/v5p megacore (2 TCs) falls back to the single-core path.
    try:
        kind = jax.devices()[0].device_kind.lower()
    except Exception:
        return 1
    return 2 if "v7" in kind else 1


def longitudinal_loss(logits, labels, *, reduction="sum", pos_weight=None,
                      max_block_rows=_MAX_BLOCK_ROWS):
    """Pallas implementation of Longitudinal_Loss.forward ('sum' / 'mean').

    The kernel is HBM-bandwidth bound and streams the inputs in their native
    dtype (upcasting per-vreg in VMEM), so callers that can keep logits and
    labels in bfloat16 in HBM roughly halve the wall-clock time.
    """
    p = 1.0 if pos_weight is None else float(pos_weight)
    assert logits.shape == labels.shape
    n = int(math.prod(logits.shape))

    # Metadata-only flatten; keep native dtype (cast to f32 happens in-kernel).
    flat_logits = jnp.reshape(logits, (-1,))
    flat_labels = jnp.reshape(labels, (-1,))

    # Pad to a whole number of (8,128) vregs.  Padded labels are NaN, so the
    # kernel's validity mask drops them from both the sum and the count.
    tile = _SUBLANES * _LANES
    rem = n % tile
    if rem:
        pad = tile - rem
        flat_logits = jnp.concatenate(
            [flat_logits, jnp.zeros((pad,), flat_logits.dtype)])
        flat_labels = jnp.concatenate(
            [flat_labels, jnp.full((pad,), jnp.nan, flat_labels.dtype)])

    rows = flat_logits.shape[0] // _LANES              # multiple of 8
    logits2d = jnp.reshape(flat_logits, (rows, _LANES))
    labels2d = jnp.reshape(flat_labels, (rows, _LANES))

    max_block_rows = max(_SUBLANES,
                         (int(max_block_rows) // _SUBLANES) * _SUBLANES)
    ncores = _tensorcore_count()

    # Row tile: as large as VMEM comfortably allows, split over the cores.
    if ncores == 1:
        block_rows = min(rows, max_block_rows)
    else:
        block_rows = min(max_block_rows,
                         _round_up(pl.cdiv(rows, ncores), _SUBLANES))
        if block_rows >= rows:
            block_rows = rows
    nblocks = pl.cdiv(rows, block_rows)
    # Prefer a block count divisible by the core count so no core re-reads a
    # clamped "phantom" block (wasted HBM traffic).
    if ncores > 1 and nblocks > 1 and nblocks % ncores:
        alt = _round_up(pl.cdiv(rows, _round_up(nblocks, ncores)), _SUBLANES)
        if alt >= _SUBLANES:
            block_rows = alt
            nblocks = pl.cdiv(rows, block_rows)
    blocks_per_core = pl.cdiv(nblocks, ncores)
    grid = (ncores, blocks_per_core)

    def in_index_map(i, j):
        # Clamp phantom blocks (when nblocks doesn't split evenly) onto the
        # last real block; their rows are masked out in-kernel anyway.
        return (jnp.minimum(i * blocks_per_core + j, nblocks - 1), 0)

    kernel = functools.partial(_longitudinal_loss_kernel,
                               pos_weight=p, valid_rows=rows,
                               block_rows=block_rows)

    if ncores > 1:
        # v7x: explicit cross-TensorCore sharding of the leading axis.
        semantics = (pltpu.CORE_PARALLEL, pltpu.ARBITRARY)
    else:
        # Single-TC chips: size-1 leading axis, plain sequential reduction.
        semantics = ("arbitrary", "arbitrary")

    partials = pl.pallas_call(
        kernel,
        out_shape=jax.ShapeDtypeStruct((ncores, 2), jnp.float32),
        grid_spec=pltpu.PrefetchScalarGridSpec(
            num_scalar_prefetch=0,
            grid=grid,
            in_specs=[
                pl.BlockSpec((block_rows, _LANES), in_index_map),
                pl.BlockSpec((block_rows, _LANES), in_index_map),
            ],
            out_specs=pl.BlockSpec((1, 2), lambda i, j: (i, 0),
                                   memory_space=pltpu.SMEM),
            scratch_shapes=[
                pltpu.VMEM((_SUBLANES, _LANES), jnp.float32),  # loss partials
                pltpu.VMEM((_SUBLANES, _LANES), jnp.float32),  # count partials
            ],
        ),
        compiler_params=pltpu.CompilerParams(
            dimension_semantics=semantics,
            vmem_limit_bytes=_VMEM_LIMIT_BYTES),
    )(logits2d, labels2d)

    total = jnp.sum(partials[:, 0])
    count = jnp.sum(partials[:, 1])

    if reduction == "sum":
        return total
    elif reduction == "mean":
        return total / count
    else:
        # TODO(synk): reduction=None in PyTorch returns the dynamically-shaped
        # masked vector L; not expressible with static Pallas output shapes.
        raise NotImplementedError("only 'sum' and 'mean' reductions supported")


def _reference_loss(logits, labels, reduction="sum", pos_weight=None):
    """Pure-JAX reference with torch's exact formulation (sigmoid + logs)."""
    p = 1.0 if pos_weight is None else float(pos_weight)
    logits = logits.astype(jnp.float32).ravel()
    labels = labels.astype(jnp.float32).ravel()
    valid = ~jnp.isnan(labels)
    lab = jnp.where(valid, labels, 0.0)
    s = jax.nn.sigmoid(logits)
    L = p * lab * (-jnp.log(s)) + (1.0 - lab) * (-jnp.log(1.0 - s))
    keep = valid & ~jnp.isnan(L)
    L = jnp.where(keep, L, 0.0)
    if reduction == "sum":
        return jnp.sum(L)
    return jnp.sum(L) / jnp.sum(keep.astype(jnp.float32))


if __name__ == "__main__":
    key = jax.random.PRNGKey(0)
    k1, k2, k3 = jax.random.split(key, 3)

    B, C, H, W = 2, 4, 16, 16  # NCHW, matching typical module usage
    logits = jax.random.normal(k1, (B, C, H, W), dtype=jnp.float32)
    labels = jax.random.bernoulli(k2, 0.5, (B, C, H, W)).astype(jnp.float32)
    nan_mask = jax.random.bernoulli(k3, 0.25, (B, C, H, W))   # ~25% missing
    labels = jnp.where(nan_mask, jnp.nan, labels)

    out_sum = longitudinal_loss(logits, labels, reduction="sum", pos_weight=2.0)
    out_mean = longitudinal_loss(logits, labels, reduction="mean", pos_weight=2.0)
    jax.block_until_ready((out_sum, out_mean))

    ref_sum = _reference_loss(logits, labels, "sum", 2.0)
    ref_mean = _reference_loss(logits, labels, "mean", 2.0)
    assert jnp.allclose(out_sum, ref_sum, rtol=1e-4, atol=1e-4), (out_sum, ref_sum)
    assert jnp.allclose(out_mean, ref_mean, rtol=1e-4, atol=1e-4), (out_mean, ref_mean)

    # Odd shape: exercises NaN-padding, multi-step grid and the masked tail.
    k4, k5, k6 = jax.random.split(jax.random.PRNGKey(1), 3)
    logits2 = 3.0 * jax.random.normal(k4, (41, 130), dtype=jnp.float32)
    labels2 = jax.random.bernoulli(k5, 0.5, (41, 130)).astype(jnp.float32)
    labels2 = jnp.where(jax.random.bernoulli(k6, 0.3, (41, 130)), jnp.nan, labels2)
    for red in ("sum", "mean"):
        got = longitudinal_loss(logits2, labels2, reduction=red,
                                max_block_rows=32)
        ref = _reference_loss(logits2, labels2, red, None)
        assert jnp.allclose(got, ref, rtol=1e-4, atol=1e-4), (red, got, ref)

    # Multi-step accumulation with a forced small tile.
    got = longitudinal_loss(logits, labels, reduction="mean", pos_weight=2.0,
                            max_block_rows=8)
    assert jnp.allclose(got, ref_mean, rtol=1e-4, atol=1e-4), (got, ref_mean)

    # Native bf16 streaming (halves HBM traffic; kernel upcasts per-vreg).
    lb = logits.astype(jnp.bfloat16)
    yb = labels.astype(jnp.bfloat16)
    got_bf16 = longitudinal_loss(lb, yb, reduction="sum", pos_weight=2.0)
    ref_bf16 = _reference_loss(lb.astype(jnp.float32), yb.astype(jnp.float32),
                               "sum", 2.0)
    assert jnp.allclose(got_bf16, ref_bf16, rtol=1e-4, atol=1e-3), (got_bf16, ref_bf16)

    jax.block_until_ready(got_bf16)
    print("KERNEL_OK")
</pallas_src>

<mosaic_0001>
module attributes {stable_mosaic.version = 11 : i64} {
  func.func @_longitudinal_loss_kernel(%arg0: i32, %arg1: i32, %arg2: memref<16x128xf32, #tpu.memory_space<vmem>>, %arg3: memref<16x128xf32, #tpu.memory_space<vmem>>, %arg4: memref<1x2xf32, #tpu.memory_space<smem>>, %arg5: memref<8x128xf32, #tpu.memory_space<vmem>>, %arg6: memref<8x128xf32, #tpu.memory_space<vmem>>) attributes {dimension_semantics = [#tpu.dimension_semantics<arbitrary>, #tpu.dimension_semantics<arbitrary>], iteration_bounds = array<i64: 1, 1>, scalar_prefetch = 0 : i64, scratch_operands = 2 : i64, tpu.core_type = #tpu.core_type<tc>, window_params = [{transform_indices = @transform_0, window_bounds = array<i64: 16, 128>}, {transform_indices = @transform_1, window_bounds = array<i64: 16, 128>}, {transform_indices = @transform_2, window_bounds = array<i64: 1, 2>}]} {
    %c0_i32 = arith.constant 0 : i32
    %0 = arith.cmpi eq, %arg1, %c0_i32 : i32
    %1 = arith.extui %0 : i1 to i32
    %c0_i32_0 = arith.constant 0 : i32
    %2 = arith.cmpi ne, %1, %c0_i32_0 : i32
    scf.if %2 {
      %cst_11 = arith.constant 0.000000e+00 : f32
      %18 = vector.broadcast %cst_11 : f32 to vector<8x128xf32>
      %c0_12 = arith.constant 0 : index
      %c0_13 = arith.constant 0 : index
      %19 = vector.load %arg5[%c0_12, %c0_13] : memref<8x128xf32, #tpu.memory_space<vmem>>, vector<8x128xf32>
      tpu.vector_store %arg5[%c0_12, %c0_13], %18 {strides = array<i32>} : memref<8x128xf32, #tpu.memory_space<vmem>>, vector<8x128xf32>,
      %cst_14 = arith.constant 0.000000e+00 : f32
      %20 = vector.broadcast %cst_14 : f32 to vector<8x128xf32>
      %c0_15 = arith.constant 0 : index
      %c0_16 = arith.constant 0 : index
      %21 = vector.load %arg6[%c0_15, %c0_16] : memref<8x128xf32, #tpu.memory_space<vmem>>, vector<8x128xf32>
      tpu.vector_store %arg6[%c0_15, %c0_16], %20 {strides = array<i32>} : memref<8x128xf32, #tpu.memory_space<vmem>>, vector<8x128xf32>,
    } else {
    }
    %c1_i32 = arith.constant 1 : i32
    %3 = arith.muli %arg0, %c1_i32 : i32
    %4 = arith.addi %3, %arg1 : i32
    %c16_i32 = arith.constant 16 : i32
    %5 = arith.muli %4, %c16_i32 : i32
    %c0 = arith.constant 0 : index
    %c0_1 = arith.constant 0 : index
    %6 = vector.load %arg2[%c0, %c0_1] : memref<16x128xf32, #tpu.memory_space<vmem>>, vector<16x128xf32>
    %c0_2 = arith.constant 0 : index
    %c0_3 = arith.constant 0 : index
    %7 = vector.load %arg3[%c0_2, %c0_3] : memref<16x128xf32, #tpu.memory_space<vmem>>, vector<16x128xf32>
    %c16_i32_4 = arith.constant 16 : i32
    %8 = arith.addi %5, %c16_i32_4 : i32
    %c16_i32_5 = arith.constant 16 : i32
    %9 = arith.cmpi sle, %8, %c16_i32_5 : i32
    %10 = arith.extui %9 : i1 to i32
    %cst = arith.constant 2.000000e+00 : f32
    %c0_i32_6 = arith.constant 0 : i32
    %11 = arith.cmpi ne, %10, %c0_i32_6 : i32
    scf.if %11 {
      %18 = arith.cmpf oeq, %7, %7 : vector<16x128xf32>
      %cst_11 = arith.constant 0.000000e+00 : f32
      %19 = vector.broadcast %cst_11 : f32 to vector<16x128xf32>
      %20 = arith.select %18, %7, %19 : vector<16x128xi1>, vector<16x128xf32>
      %21 = math.absf %6 : vector<16x128xf32>
      %cst_12 = arith.constant 0.000000e+00 : f32
      %22 = vector.broadcast %cst_12 : f32 to vector<16x128xf32>
      %23 = arith.subf %22, %21 : vector<16x128xf32>
      %24 = math.exp %23 : vector<16x128xf32>
      %cst_13 = arith.constant 0.000000e+00 : f32
      %25 = vector.broadcast %cst_13 : f32 to vector<16x128xf32>
      %26 = arith.subf %25, %6 : vector<16x128xf32>
      %cst_14 = arith.constant 0.000000e+00 : f32
      %27 = vector.broadcast %cst_14 : f32 to vector<16x128xf32>
      %28 = arith.maximumf %26, %27 : vector<16x128xf32>
      %cst_15 = arith.constant 1.000000e+00 : f32
      %29 = vector.broadcast %cst_15 : f32 to vector<16x128xf32>
      %30 = arith.addf %29, %24 : vector<16x128xf32>
      %31 = math.log %30 : vector<16x128xf32>
      %32 = arith.addf %28, %31 : vector<16x128xf32>
      %33 = arith.addf %32, %6 : vector<16x128xf32>
      %34 = vector.broadcast %cst : f32 to vector<16x128xf32>
      %35 = arith.mulf %34, %20 : vector<16x128xf32>
      %36 = arith.mulf %35, %32 : vector<16x128xf32>
      %cst_16 = arith.constant 1.000000e+00 : f32
      %37 = vector.broadcast %cst_16 : f32 to vector<16x128xf32>
      %38 = arith.subf %37, %20 : vector<16x128xf32>
      %39 = arith.mulf %38, %33 : vector<16x128xf32>
      %40 = arith.addf %36, %39 : vector<16x128xf32>
      %cst_17 = arith.constant 1.000000e+00 : f32
      %41 = vector.broadcast %cst_17 : f32 to vector<16x128xf32>
      %42 = arith.cmpf oeq, %20, %41 : vector<16x128xf32>
      %cst_18 = arith.constant 16.6355324 : f32
      %43 = vector.broadcast %cst_18 : f32 to vector<16x128xf32>
      %44 = arith.cmpf oge, %6, %43 : vector<16x128xf32>
      %45 = arith.andi %42, %44 : vector<16x128xi1>
      %cst_19 = arith.constant 0.000000e+00 : f32
      %46 = vector.broadcast %cst_19 : f32 to vector<16x128xf32>
      %47 = arith.cmpf oeq, %20, %46 : vector<16x128xf32>
      %cst_20 = arith.constant -88.7228394 : f32
      %48 = vector.broadcast %cst_20 : f32 to vector<16x128xf32>
      %49 = arith.cmpf ole, %6, %48 : vector<16x128xf32>
      %50 = arith.andi %47, %49 : vector<16x128xi1>
      %51 = arith.ori %45, %50 : vector<16x128xi1>
      %cst_21 = arith.constant dense<true> : vector<16x128xi1>
      %52 = arith.xori %51, %cst_21 : vector<16x128xi1>
      %53 = arith.andi %18, %52 : vector<16x128xi1>
      %cst_22 = arith.constant 0.000000e+00 : f32
      %54 = vector.broadcast %cst_22 : f32 to vector<16x128xf32>
      %55 = arith.select %53, %40, %54 : vector<16x128xi1>, vector<16x128xf32>
      %56 = arith.extui %53 : vector<16x128xi1> to vector<16x128xi32>
      %57 = arith.sitofp %56 : vector<16x128xi32> to vector<16x128xf32>
      %c0_23 = arith.constant 0 : index
      %c0_24 = arith.constant 0 : index
      %58 = vector.load %arg5[%c0_23, %c0_24] : memref<8x128xf32, #tpu.memory_space<vmem>>, vector<8x128xf32>
      %59 = vector.shape_cast %55 : vector<16x128xf32> to vector<2x8x128xf32>
      %cst_25 = arith.constant dense<0.000000e+00> : vector<8x128xf32>
      %60 = vector.multi_reduction <add>, %59, %cst_25 [0] : vector<2x8x128xf32> to vector<8x128xf32>
      %61 = arith.addf %58, %60 : vector<8x128xf32>
      %c0_26 = arith.constant 0 : index
      %c0_27 = arith.constant 0 : index
      %62 = vector.load %arg5[%c0_26, %c0_27] : memref<8x128xf32, #tpu.memory_space<vmem>>, vector<8x128xf32>
      tpu.vector_store %arg5[%c0_26, %c0_27], %61 {strides = array<i32>} : memref<8x128xf32, #tpu.memory_space<vmem>>, vector<8x128xf32>,
      %c0_28 = arith.constant 0 : index
      %c0_29 = arith.constant 0 : index
      %63 = vector.load %arg6[%c0_28, %c0_29] : memref<8x128xf32, #tpu.memory_space<vmem>>, vector<8x128xf32>
      %64 = vector.shape_cast %57 : vector<16x128xf32> to vector<2x8x128xf32>
      %cst_30 = arith.constant dense<0.000000e+00> : vector<8x128xf32>
      %65 = vector.multi_reduction <add>, %64, %cst_30 [0] : vector<2x8x128xf32> to vector<8x128xf32>
      %66 = arith.addf %63, %65 : vector<8x128xf32>
      %c0_31 = arith.constant 0 : index
      %c0_32 = arith.constant 0 : index
      %67 = vector.load %arg6[%c0_31, %c0_32] : memref<8x128xf32, #tpu.memory_space<vmem>>, vector<8x128xf32>
      tpu.vector_store %arg6[%c0_31, %c0_32], %66 {strides = array<i32>} : memref<8x128xf32, #tpu.memory_space<vmem>>, vector<8x128xf32>,
    } else {
    }
    %true = arith.constant true
    %12 = arith.xori %9, %true : i1
    %13 = arith.extui %12 : i1 to i32
    %cst_7 = arith.constant 2.000000e+00 : f32
    %c0_i32_8 = arith.constant 0 : i32
    %14 = arith.cmpi ne, %13, %c0_i32_8 : i32
    scf.if %14 {
      %18 = tpu.iota {dimensions = array<i32: 0>} : vector<16x128xi32>
      %19 = vector.broadcast %5 : i32 to vector<16x128xi32>
      %20 = arith.addi %19, %18 : vector<16x128xi32>
      %c16_i32_11 = arith.constant 16 : i32
      %21 = vector.broadcast %c16_i32_11 : i32 to vector<16x128xi32>
      %22 = arith.cmpi slt, %20, %21 : vector<16x128xi32>
      %23 = arith.cmpf oeq, %7, %7 : vector<16x128xf32>
      %cst_12 = arith.constant 0.000000e+00 : f32
      %24 = vector.broadcast %cst_12 : f32 to vector<16x128xf32>
      %25 = arith.select %23, %7, %24 : vector<16x128xi1>, vector<16x128xf32>
      %26 = math.absf %6 : vector<16x128xf32>
      %cst_13 = arith.constant 0.000000e+00 : f32
      %27 = vector.broadcast %cst_13 : f32 to vector<16x128xf32>
      %28 = arith.subf %27, %26 : vector<16x128xf32>
      %29 = math.exp %28 : vector<16x128xf32>
      %cst_14 = arith.constant 0.000000e+00 : f32
      %30 = vector.broadcast %cst_14 : f32 to vector<16x128xf32>
      %31 = arith.subf %30, %6 : vector<16x128xf32>
      %cst_15 = arith.constant 0.000000e+00 : f32
      %32 = vector.broadcast %cst_15 : f32 to vector<16x128xf32>
      %33 = arith.maximumf %31, %32 : vector<16x128xf32>
      %cst_16 = arith.constant 1.000000e+00 : f32
      %34 = vector.broadcast %cst_16 : f32 to vector<16x128xf32>
      %35 = arith.addf %34, %29 : vector<16x128xf32>
      %36 = math.log %35 : vector<16x128xf32>
      %37 = arith.addf %33, %36 : vector<16x128xf32>
      %38 = arith.addf %37, %6 : vector<16x128xf32>
      %39 = vector.broadcast %cst_7 : f32 to vector<16x128xf32>
      %40 = arith.mulf %39, %25 : vector<16x128xf32>
      %41 = arith.mulf %40, %37 : vector<16x128xf32>
      %cst_17 = arith.constant 1.000000e+00 : f32
      %42 = vector.broadcast %cst_17 : f32 to vector<16x128xf32>
      %43 = arith.subf %42, %25 : vector<16x128xf32>
      %44 = arith.mulf %43, %38 : vector<16x128xf32>
      %45 = arith.addf %41, %44 : vector<16x128xf32>
      %cst_18 = arith.constant 1.000000e+00 : f32
      %46 = vector.broadcast %cst_18 : f32 to vector<16x128xf32>
      %47 = arith.cmpf oeq, %25, %46 : vector<16x128xf32>
      %cst_19 = arith.constant 16.6355324 : f32
      %48 = vector.broadcast %cst_19 : f32 to vector<16x128xf32>
      %49 = arith.cmpf oge, %6, %48 : vector<16x128xf32>
      %50 = arith.andi %47, %49 : vector<16x128xi1>
      %cst_20 = arith.constant 0.000000e+00 : f32
      %51 = vector.broadcast %cst_20 : f32 to vector<16x128xf32>
      %52 = arith.cmpf oeq, %25, %51 : vector<16x128xf32>
      %cst_21 = arith.constant -88.7228394 : f32
      %53 = vector.broadcast %cst_21 : f32 to vector<16x128xf32>
      %54 = arith.cmpf ole, %6, %53 : vector<16x128xf32>
      %55 = arith.andi %52, %54 : vector<16x128xi1>
      %56 = arith.ori %50, %55 : vector<16x128xi1>
      %cst_22 = arith.constant dense<true> : vector<16x128xi1>
      %57 = arith.xori %56, %cst_22 : vector<16x128xi1>
      %58 = arith.andi %23, %57 : vector<16x128xi1>
      %59 = arith.andi %58, %22 : vector<16x128xi1>
      %cst_23 = arith.constant 0.000000e+00 : f32
      %60 = vector.broadcast %cst_23 : f32 to vector<16x128xf32>
      %61 = arith.select %59, %45, %60 : vector<16x128xi1>, vector<16x128xf32>
      %62 = arith.extui %59 : vector<16x128xi1> to vector<16x128xi32>
      %63 = arith.sitofp %62 : vector<16x128xi32> to vector<16x128xf32>
      %c0_24 = arith.constant 0 : index
      %c0_25 = arith.constant 0 : index
      %64 = vector.load %arg5[%c0_24, %c0_25] : memref<8x128xf32, #tpu.memory_space<vmem>>, vector<8x128xf32>
      %65 = vector.shape_cast %61 : vector<16x128xf32> to vector<2x8x128xf32>
      %cst_26 = arith.constant dense<0.000000e+00> : vector<8x128xf32>
      %66 = vector.multi_reduction <add>, %65, %cst_26 [0] : vector<2x8x128xf32> to vector<8x128xf32>
      %67 = arith.addf %64, %66 : vector<8x128xf32>
      %c0_27 = arith.constant 0 : index
      %c0_28 = arith.constant 0 : index
      %68 = vector.load %arg5[%c0_27, %c0_28] : memref<8x128xf32, #tpu.memory_space<vmem>>, vector<8x128xf32>
      tpu.vector_store %arg5[%c0_27, %c0_28], %67 {strides = array<i32>} : memref<8x128xf32, #tpu.memory_space<vmem>>, vector<8x128xf32>,
      %c0_29 = arith.constant 0 : index
      %c0_30 = arith.constant 0 : index
      %69 = vector.load %arg6[%c0_29, %c0_30] : memref<8x128xf32, #tpu.memory_space<vmem>>, vector<8x128xf32>
      %70 = vector.shape_cast %63 : vector<16x128xf32> to vector<2x8x128xf32>
      %cst_31 = arith.constant dense<0.000000e+00> : vector<8x128xf32>
      %71 = vector.multi_reduction <add>, %70, %cst_31 [0] : vector<2x8x128xf32> to vector<8x128xf32>
      %72 = arith.addf %69, %71 : vector<8x128xf32>
      %c0_32 = arith.constant 0 : index
      %c0_33 = arith.constant 0 : index
      %73 = vector.load %arg6[%c0_32, %c0_33] : memref<8x128xf32, #tpu.memory_space<vmem>>, vector<8x128xf32>
      tpu.vector_store %arg6[%c0_32, %c0_33], %72 {strides = array<i32>} : memref<8x128xf32, #tpu.memory_space<vmem>>, vector<8x128xf32>,
    } else {
    }
    %c0_i32_9 = arith.constant 0 : i32
    %15 = arith.cmpi eq, %arg1, %c0_i32_9 : i32
    %16 = arith.extui %15 : i1 to i32
    %c0_i32_10 = arith.constant 0 : i32
    %17 = arith.cmpi ne, %16, %c0_i32_10 : i32
    scf.if %17 {
      %c0_11 = arith.constant 0 : index
      %c0_12 = arith.constant 0 : index
      %18 = vector.load %arg5[%c0_11, %c0_12] : memref<8x128xf32, #tpu.memory_space<vmem>>, vector<8x128xf32>
      %19 = vector.shape_cast %18 : vector<8x128xf32> to vector<1x8x128xf32>
      %cst_13 = arith.constant dense<0.000000e+00> : vector<1xf32>
      %20 = vector.multi_reduction <add>, %19, %cst_13 [1, 2] : vector<1x8x128xf32> to vector<1xf32>
      %21 = vector.shape_cast %20 : vector<1xf32> to vector<1x1x1xf32>
      %22 = vector.extract %21[0, 0, 0] : f32 from vector<1x1x1xf32>
      %c0_14 = arith.constant 0 : index
      %c0_15 = arith.constant 0 : index
      %23 = memref.load %arg4[%c0_14, %c0_15] : memref<1x2xf32, #tpu.memory_space<smem>>
      memref.store %22, %arg4[%c0_14, %c0_15] : memref<1x2xf32, #tpu.memory_space<smem>>
      %c0_16 = arith.constant 0 : index
      %c0_17 = arith.constant 0 : index
      %24 = vector.load %arg6[%c0_16, %c0_17] : memref<8x128xf32, #tpu.memory_space<vmem>>, vector<8x128xf32>
      %25 = vector.shape_cast %24 : vector<8x128xf32> to vector<1x8x128xf32>
      %cst_18 = arith.constant dense<0.000000e+00> : vector<1xf32>
      %26 = vector.multi_reduction <add>, %25, %cst_18 [1, 2] : vector<1x8x128xf32> to vector<1xf32>
      %27 = vector.shape_cast %26 : vector<1xf32> to vector<1x1x1xf32>
      %28 = vector.extract %27[0, 0, 0] : f32 from vector<1x1x1xf32>
      %c0_19 = arith.constant 0 : index
      %c1 = arith.constant 1 : index
      %29 = memref.load %arg4[%c0_19, %c1] : memref<1x2xf32, #tpu.memory_space<smem>>
      memref.store %28, %arg4[%c0_19, %c1] : memref<1x2xf32, #tpu.memory_space<smem>>
    } else {
    }
    return
  }
  func.func @transform_0(%arg0: i32, %arg1: i32) -> (i32, i32) {
    %c1_i32 = arith.constant 1 : i32
    %0 = arith.muli %arg0, %c1_i32 : i32
    %1 = arith.addi %0, %arg1 : i32
    %c0_i32 = arith.constant 0 : i32
    %2 = arith.minsi %1, %c0_i32 : i32
    %c0_i32_0 = arith.constant 0 : i32
    %c0_i32_1 = arith.constant 0 : i32
    return %2, %c0_i32_0 : i32, i32
  }
  func.func @transform_1(%arg0: i32, %arg1: i32) -> (i32, i32) {
    %c1_i32 = arith.constant 1 : i32
    %0 = arith.muli %arg0, %c1_i32 : i32
    %1 = arith.addi %0, %arg1 : i32
    %c0_i32 = arith.constant 0 : i32
    %2 = arith.minsi %1, %c0_i32 : i32
    %c0_i32_0 = arith.constant 0 : i32
    %c0_i32_1 = arith.constant 0 : i32
    return %2, %c0_i32_0 : i32, i32
  }
  func.func @transform_2(%arg0: i32, %arg1: i32) -> (i32, i32) {
    %c0_i32 = arith.constant 0 : i32
    %c0_i32_0 = arith.constant 0 : i32
    return %arg0, %c0_i32 : i32, i32
  }
}

</mosaic_0001>

<bundles_post_ra>
// kernel: tpu_custom_call.1
= control target key start
LH: loop header
LB: loop body
LE: loop exit
PB: predicated region body
PF: predicated region fallthrough
CT: control target
= control target key end

     0   :  { %7 = vsyncpa [#allocation5], 0  ;;  %s441_s0 = inlined_call_operand.hbm [shape: f32[16,128], index: 0, kind: input, shape index: {}]   ;;  %s442_s1 = inlined_call_operand.hbm [shape: f32[16,128], index: 1, kind: input, shape index: {}]   ;;  %s443_s2 = inlined_call_operand.hbm [shape: f32[1,2], index: 2, kind: output, shape index: {}]  }
   0x1   :  { %8 = vsyncpa [#allocation8], 0 }
   0x2   :  { %9 = vsyncpa [#allocation6], 0  ;;  %s355_s9 = smov [#allocation4]   ;;  %s295_s13 = scalar_lea.hbm %s441_s0, 256 }
   0x3   :  { %s21_s10 = sshll.u32 %s355_s9, 4  ;;  %p296_p0 = scmp.ne.s32.totalorder %s441_s0, %s295_s13  ;;  %s22_s10 = int_to_ptr.vmem [resolvable:$true] %s21_s10 }
   0x4   :  { %p299_p1 = scmp.lt.u32.totalorder %s295_s13, %s441_s0 }
   0x6   :  { %p301_p2 = pnand %p299_p1, %p296_p0 }
   0x8   :  { %304 = shalt.err (!%p301_p2)
}
   0x9   :  { %s305_s18 = scalar_lea.vmem %s22_s10, 256  ;;  %p310_p4 = scmp.lt.s32.totalorder %s22_s10, %s22_s10 }
   0xa   :  { %p306_p3 = scmp.ne.s32.totalorder %s22_s10, %s305_s18  ;;  %p311_p5 = scmp.lt.s32.totalorder %s305_s18, %s305_s18 }
   0xc   :  { %p312_p6 = por %p311_p5, %p310_p4 }
   0xe   :  { %p313_p7 = pnand %p312_p6, %p306_p3 }
  0x10   :  { %316 = shalt.err (!%p313_p7)
}
  0x11   :  { %s356_s19 = smov 128   ;;  %s357_s20 = smov 8  }
  0x12   :  { %27 = dma.hbm_to_vmem [thread:$0]  %s441_s0, 256, %s22_s10, [#allocation5], %s356_s19, %s356_s19, %s357_s20  }
  0x13   :  { %s358_s23 = smov [#allocation7]   ;;  %s317_s27 = scalar_lea.hbm %s442_s1, 256 }
  0x14   :  { %s39_s24 = sshll.u32 %s358_s23, 4  ;;  %p318_p8 = scmp.ne.s32.totalorder %s442_s1, %s317_s27  ;;  %s40_s24 = int_to_ptr.vmem [resolvable:$true] %s39_s24 }
  0x15   :  { %p321_p9 = scmp.lt.u32.totalorder %s317_s27, %s442_s1 }
  0x17   :  { %p323_p10 = pnand %p321_p9, %p318_p8 }
  0x19   :  { %326 = shalt.err (!%p323_p10)
}
  0x1a   :  { %s327_s4 = scalar_lea.vmem %s40_s24, 256  ;;  %p332_p12 = scmp.lt.s32.totalorder %s40_s24, %s40_s24 }
  0x1b   :  { %p328_p11 = scmp.ne.s32.totalorder %s40_s24, %s327_s4  ;;  %p333_p13 = scmp.lt.s32.totalorder %s327_s4, %s327_s4 }
  0x1d   :  { %p334_p0 = por %p333_p13, %p332_p12 }
  0x1f   :  { %p335_p1 = pnand %p334_p0, %p328_p11 }
  0x21   :  { %338 = shalt.err (!%p335_p1)
}
  0x22   :  { %45 = dma.hbm_to_vmem [thread:$0]  %s442_s1, 256, %s40_s24, [#allocation8], %s356_s19, %s356_s19, %s357_s20  }
  0x23   :  { %349 = dma.done.wait [#allocation5], 256  }
  0x24   :  { %350 = vsyncadd [#allocation5], 4294967040 }
  0x25   :  { %351 = dma.done.wait [#allocation8], 256  }
  0x26   :  { %352 = vsyncadd [#allocation8], 4294967040  ;;  %v68_v0 = vld [vmem:[#allocation4] sm:$0xff]  ;;  %v69_v1 = vld [vmem:[#allocation4 + $0x8] sm:$0xff]  ;;  %v360_v44 = vmov 0.0   ;;  %s339_s9 = scalar_lea.hbm %s443_s2, 16 }
  0x27   :  { %v81_v2 = vand.u32 2147483647, %v68_v0  ;;  %v82_v3 = vand.u32 2147483647, %v69_v1  ;;  %v70_v8 = vld [vmem:[#allocation7] sm:$0xff]  ;;  %v71_v9 = vld [vmem:[#allocation7 + $0x8] sm:$0xff]  ;;  %p340_p2 = scmp.ne.s32.totalorder %s443_s2, %s339_s9  ;;  %p343_p3 = scmp.lt.u32.totalorder %s339_s9, %s443_s2 }
  0x28   :  { %vm77_vm0 = vcmp.eq.f32.partialorder %v70_v8, %v70_v8  ;;  %vm78_vm1 = vcmp.eq.f32.partialorder %v71_v9, %v71_v9  ;;  %vm115_vm3 = vcmp.ge.f32.partialorder %v68_v0, 16.635532  ;;  %v89_v16 = vsub.f32 0.0, %v68_v0 }
  0x29   :  { %v83_v4 = vsub.f32 0.0, %v81_v2  ;;  %v84_v5 = vsub.f32 0.0, %v82_v3  ;;  %v79_v14 = vsel %vm77_vm0, %v70_v8, 0.0  ;;  %v80_v15 = vsel %vm78_vm1, %v71_v9, 0.0  ;;  %p345_p4 = pnand %p343_p3, %p340_p2 }
  0x2a   :  { %vm113_vm2 = vcmp.eq.f32.partialorder %v79_v14, 1.0  ;;  %vm114_vm4 = vcmp.eq.f32.partialorder %v80_v15, 1.0  ;;  %vm116_vm5 = vcmp.ge.f32.partialorder %v69_v1, 16.635532  ;;  %v90_v17 = vsub.f32 0.0, %v69_v1 }
  0x2b   :  { %v85_v6 = vmul.f32 1.442695, %v83_v4  ;;  %v87_v7 = vmul.f32 1.442695, %v84_v5  ;;  %vm119_vm6 = vcmp.eq.f32.partialorder %v79_v14, 0.0  ;;  %vm403_vm8 = vmand %vm113_vm2, %vm115_vm3  ;;  %vm120_vm9 = vcmp.eq.f32.partialorder %v80_v15, 0.0 }
  0x2c   :  { %vm121_vm7 = vcmp.le.f32.partialorder %v68_v0, -88.72284  ;;  %vm122_vm10 = vcmp.le.f32.partialorder %v69_v1, -88.72284  ;;  %vm407_vm11 = vmand %vm114_vm4, %vm116_vm5  ;;  %v91_v20 = vmax.f32 %v89_v16, 0.0  ;;  %v92_v23 = vmax.f32 %v90_v17, 0.0 }
  0x2d   :  { %287 = vpow2.f32 %v85_v6  ;;  %vm411_vm12 = vmand %vm119_vm6, %vm121_vm7  ;;  %v103_v27 = vmul.f32 2.0, %v79_v14  ;;  %v104_v29 = vmul.f32 2.0, %v80_v15  ;;  %v107_v31 = vsub.f32 1.0, %v79_v14 }
  0x2e   :  { %289 = vpow2.f32 %v87_v7  ;;  %vm415_vm13 = vmand %vm120_vm9, %vm122_vm10  ;;  %v108_v33 = vsub.f32 1.0, %v80_v15  ;;  %vm359_vm2 = vmmov 1  }
  0x2f   :  { %vm125_vm14 = vmor %vm403_vm8, %vm411_vm12 }
  0x30   :  { %vm126_vm15 = vmor %vm407_vm11, %vm415_vm13 }
  0x31   :  { %vm127_vm3 = vmxor %vm125_vm14, %vm359_vm2 }
  0x32   :  { %vm128_vm4 = vmxor %vm126_vm15, %vm359_vm2 }
  0x33   :  { %vm129_vm5 = vmand %vm77_vm0, %vm127_vm3 }
  0x34   :  { %vm130_vm6 = vmand %vm78_vm1, %vm128_vm4  ;;  %v272_v45 = vsel %vm129_vm5, 1.0, %v360_v44 }
  0x35   :  { %v273_v46 = vsel %vm130_vm6, 1.0, %v360_v44 }
  0x36   :  { %v142_v48 = vadd.f32 %v273_v46, %v272_v45 }
  0x37   :  { %v288_v10 = vpop.eup %287 }
  0x38   :  { %v290_v11 = vpop.eup %289  ;;  %v93_v12 = vadd.f32 1.0, %v288_v10 }
  0x39   :  { %v94_v13 = vadd.f32 1.0, %v290_v11 }
  0x3a   :  { %291 = vlog2.f32 %v93_v12 }
  0x3b   :  { %293 = vlog2.f32 %v94_v13 }
  0x44   :  { %v292_v22 = vpop.eup %291 }
  0x45   :  { %v294_v25 = vpop.eup %293  ;;  %v96_v26 = vmul.f32 0.6931472, %v292_v22 }
  0x46   :  { %v98_v28 = vmul.f32 0.6931472, %v294_v25 }
  0x47   :  { %v99_v30 = vadd.f32 %v96_v26, %v91_v20 }
  0x48   :  { %v100_v32 = vadd.f32 %v98_v28, %v92_v23 }
  0x49   :  { %v101_v34 = vadd.f32 %v99_v30, %v68_v0  ;;  %v105_v35 = vmul.f32 %v103_v27, %v99_v30 }
  0x4a   :  { %v102_v36 = vadd.f32 %v100_v32, %v69_v1  ;;  %v106_v37 = vmul.f32 %v104_v29, %v100_v32 }
  0x4b   :  { %v109_v38 = vmul.f32 %v107_v31, %v101_v34 }
  0x4c   :  { %v110_v39 = vmul.f32 %v108_v33, %v102_v36 }
  0x4d   :  { %v111_v40 = vadd.f32 %v109_v38, %v105_v35 }
  0x4e   :  { %v112_v41 = vadd.f32 %v110_v39, %v106_v37 }
  0x4f   :  { %v131_v42 = vsel %vm129_vm5, %v111_v40, 0.0 }
  0x50   :  { %v132_v43 = vsel %vm130_vm6, %v112_v41, 0.0 }
  0x51   :  { %v138_v47 = vadd.f32 %v132_v43, %v131_v42 }
  0x53   :  { %230 = vadd.xlane.f32.xlu0 %v138_v47 }
  0x57   :  { %242 = vadd.xlane.f32.xlu0 %v142_v48 }
  0xe0   :  { %v231_v49 = vpop.xlane.xlu0 %230 }
  0xe1   :  { %v232_v50 = vrot.slane %v231_v49, 4 }
  0xe3   :  { %v233_v51 = vadd.f32 %v232_v50, %v231_v49 }
  0xe4   :  { %v243_v52 = vpop.xlane.xlu0 %242 }
  0xe5   :  { %v234_v53 = vrot.slane %v233_v51, 2  ;;  %v244_v54 = vrot.slane %v243_v52, 4 }
  0xe7   :  { %v245_v55 = vadd.f32 %v244_v54, %v243_v52  ;;  %v235_v56 = vadd.f32 %v234_v53, %v233_v51 }
  0xe9   :  { %v246_v57 = vrot.slane %v245_v55, 2  ;;  %v236_v58 = vrot.slane %v235_v56, 1 }
  0xeb   :  { %v247_v59 = vadd.f32 %v246_v57, %v245_v55  ;;  %v237_v60 = vadd.f32 %v236_v58, %v235_v56 }
  0xed   :  { %276 = vpush %v237_v60  ;;  %v248_v61 = vrot.slane %v247_v59, 1 }
  0xef   :  { %v249_v62 = vadd.f32 %v248_v61, %v247_v59 }
  0xf1   :  { %278 = vpush %v249_v62 }
 0x11e   :  { %s277_s1 = spop %276 }
 0x11f   :  { %240 = sst [smem:[#allocation9]] %s277_s1 }
 0x122   :  { %s279_s6 = spop %278 }
 0x123   :  { %252 = sst [smem:[#allocation9 + $0x1]] %s279_s6 }
 0x124   :  { %348 = shalt.err (!%p345_p4)
}
 0x125   :  { %s361_s14 = smov [#allocation9]  }
 0x126   :  { %260 = dma.smem_to_hbm %s361_s14, 16, %s443_s2, [#allocation6]  }
 0x127   :  { %353 = dma.done.wait [#allocation6], 16  }
 0x128   :  { %354 = vsyncadd [#allocation6], 4294967280 }
 0x129   :  { %264 = sfence }
 0x12a   :  { %265 = vsyncpa [#allocation5], 1 }
 0x12b   :  { %266 = vsyncpa [#allocation8], 1 }
 0x12c   :  { %267 = vsyncpa [#allocation6], 1 }

</bundles_post_ra>
